<compile_context>
chip_gen: v5e
topology: v5e:2x2
jax: 0.10.0
libtpu: 0.0.40
codegen_flags: <defaults>
</compile_context>

<pallas_src>
import jax
import jax.numpy as jnp
from jax.experimental import pallas as pl
from jax.experimental.pallas import tpu as pltpu

BATCH = 2
SEQ = 8
D_MODEL = 32
FFN_HIDDEN = 64

LANE = 128     # lane width / MXU alignment
SUBLANE = 8


def _round_up(n, m):
    return ((n + m - 1) // m) * m


# ----------------------------- Pallas kernel -------------------------------

def _ffn_fused_kernel(x_ref, w1_ref, b1_ref, w2_ref, b2_ref, o_ref, acc_ref):
    # x_ref  : (block_m, d_pad)  bf16     w1_ref: (d_pad, block_h)  bf16
    # b1_ref : (1, block_h)      f32      w2_ref: (block_h, d_pad)  bf16
    # b2_ref : (1, d_pad)        f32      o_ref : (block_m, d_pad)  f32
    # acc_ref: (block_m, d_pad)  f32 VMEM scratch, resident over the hidden axis
    h_idx = pl.program_id(1)

    @pl.when(h_idx == 0)
    def _init():
        acc_ref[...] = jnp.zeros_like(acc_ref)

    # linear1: bf16 operands on the MXU, f32 accumulation; bias + ReLU in f32.
    h = jnp.dot(x_ref[...], w1_ref[...], preferred_element_type=jnp.float32)
    h = jnp.maximum(h + b1_ref[...], 0.0)
    # TODO(synk): training-mode dropout would need in-kernel PRNG
    # (pltpu.prng_seed / prng_random_bits); eval mode == identity.

    # linear2 partial product for this hidden tile, accumulated in f32.
    acc_ref[...] += jnp.dot(h.astype(w2_ref.dtype), w2_ref[...],
                            preferred_element_type=jnp.float32)

    @pl.when(h_idx == pl.num_programs(1) - 1)
    def _finalize():
        o_ref[...] = (acc_ref[...] + b2_ref[...]).astype(o_ref.dtype)


# ------------------------------- Wrapper ------------------------------------

def position_wise_ffn(x, w1, b1, w2, b2, *, max_block_m=2048, max_block_h=1024):
    """x: (..., d_model); w1: (d_model, hidden); b1: (hidden,);
    w2: (hidden, d_model); b2: (d_model,)."""
    orig_shape = x.shape
    d_model = orig_shape[-1]
    hidden = w1.shape[1]

    x2d = x.reshape(-1, d_model)
    M = x2d.shape[0]

    # --- lane-dense padding: d_model / hidden -> multiples of 128 -----------
    d_pad = _round_up(d_model, LANE)
    h_pad = _round_up(hidden, LANE)
    dd, dh = d_pad - d_model, h_pad - hidden

    x_p = jnp.pad(x2d, ((0, 0), (0, dd))).astype(jnp.bfloat16)
    w1_p = jnp.pad(w1, ((0, dd), (0, dh))).astype(jnp.bfloat16)
    w2_p = jnp.pad(w2, ((0, dh), (0, dd))).astype(jnp.bfloat16)
    b1_p = jnp.pad(b1, (0, dh)).astype(jnp.float32).reshape(1, h_pad)
    b2_p = jnp.pad(b2, (0, dd)).astype(jnp.float32).reshape(1, d_pad)

    # --- row tiling ('parallel' axis) ----------------------------------------
    block_m = min(max_block_m, _round_up(M, SUBLANE))
    # v7x has 2 TensorCores: give the parallel axis >= 2 steps when possible.
    if pl.cdiv(M, block_m) < 2 and M > SUBLANE:
        block_m = _round_up(pl.cdiv(M, 2), SUBLANE)
    grid_m = pl.cdiv(M, block_m)          # ragged last row-block is masked

    # --- hidden tiling ('arbitrary' reduction axis, kept last) --------------
    # block_h must divide h_pad exactly (a ragged reduction tile would add
    # garbage into the accumulator); h_pad is a multiple of 128 so pick the
    # largest 128-multiple divisor <= max_block_h.
    if h_pad <= max_block_h:
        block_h = h_pad
    else:
        block_h = LANE
        for cand in range(max_block_h - max_block_h % LANE, LANE - 1, -LANE):
            if h_pad % cand == 0:
                block_h = cand
                break
    grid_h = h_pad // block_h

    # Grid-invariant operands only need a single VMEM buffer.
    invariant = pl.Buffered(1)
    w_mode = pl.Buffered(1) if grid_h == 1 else None

    wbuf = 1 if grid_h == 1 else 2
    est_vmem = (
        2 * block_m * d_pad * 2            # x (bf16, double-buffered)
        + wbuf * d_pad * block_h * 2       # w1 (bf16)
        + wbuf * block_h * d_pad * 2       # w2 (bf16)
        + wbuf * block_h * 4               # b1 (f32)
        + d_pad * 4                        # b2 (f32, single-buffered)
        + 2 * block_m * d_pad * 4          # out (f32, double-buffered)
        + block_m * d_pad * 4              # f32 accumulator scratch
    )
    vmem_limit = min(64 * 1024 * 1024, max(2 * est_vmem, 32 * 1024 * 1024))

    out2d_pad = pl.pallas_call(
        _ffn_fused_kernel,
        out_shape=jax.ShapeDtypeStruct((M, d_pad), x.dtype),
        grid=(grid_m, grid_h),
        in_specs=[
            pl.BlockSpec((block_m, d_pad), lambda i, h: (i, 0)),
            pl.BlockSpec((d_pad, block_h), lambda i, h: (0, h), pipeline_mode=w_mode),
            pl.BlockSpec((1, block_h), lambda i, h: (0, h), pipeline_mode=w_mode),
            pl.BlockSpec((block_h, d_pad), lambda i, h: (h, 0), pipeline_mode=w_mode),
            pl.BlockSpec((1, d_pad), lambda i, h: (0, 0), pipeline_mode=invariant),
        ],
        out_specs=pl.BlockSpec((block_m, d_pad), lambda i, h: (i, 0)),
        scratch_shapes=[pltpu.VMEM((block_m, d_pad), jnp.float32)],
        compiler_params=pltpu.CompilerParams(
            dimension_semantics=("parallel", "arbitrary"),
            vmem_limit_bytes=vmem_limit,
        ),
        cost_estimate=pl.CostEstimate(
            flops=4 * M * d_pad * h_pad,
            transcendentals=0,
            bytes_accessed=(x_p.size * 2 + w1_p.size * 2 + w2_p.size * 2
                            + b1_p.size * 4 + b2_p.size * 4 + M * d_pad * 4),
        ),
    )(x_p, w1_p, b1_p, w2_p, b2_p)

    return out2d_pad[:, :d_model].reshape(orig_shape)


# --------------------------------- Main --------------------------------------

if __name__ == "__main__":
    key = jax.random.PRNGKey(0)
    kx, k1, k2, k3, k4 = jax.random.split(key, 5)

    x = jax.random.normal(kx, (BATCH, SEQ, D_MODEL), jnp.float32)
    w1 = jax.random.normal(k1, (D_MODEL, FFN_HIDDEN), jnp.float32) * 0.02
    b1 = jax.random.normal(k2, (FFN_HIDDEN,), jnp.float32) * 0.02
    w2 = jax.random.normal(k3, (FFN_HIDDEN, D_MODEL), jnp.float32) * 0.02
    b2 = jax.random.normal(k4, (D_MODEL,), jnp.float32) * 0.02

    fwd = jax.jit(position_wise_ffn)
    out = jax.block_until_ready(fwd(x, w1, b1, w2, b2))

    # Reference 1: same dot-operand dtypes as the kernel (bf16 dots, f32 acc).
    x2d = x.reshape(-1, D_MODEL)
    h = jnp.dot(x2d.astype(jnp.bfloat16), w1.astype(jnp.bfloat16),
                preferred_element_type=jnp.float32) + b1
    h = jnp.maximum(h, 0.0)
    ref_bf16 = (jnp.dot(h.astype(jnp.bfloat16), w2.astype(jnp.bfloat16),
                        preferred_element_type=jnp.float32) + b2).reshape(x.shape)
    # Reference 2: pure-f32 module semantics (dropout = identity in eval mode).
    ref_f32 = (jnp.maximum(x2d @ w1 + b1, 0.0) @ w2 + b2).reshape(x.shape)

    assert out.shape == (BATCH, SEQ, D_MODEL)
    assert bool(jnp.all(jnp.isfinite(out)))
    assert jnp.allclose(out, ref_bf16, atol=1e-4, rtol=1e-3), \
        float(jnp.max(jnp.abs(out - ref_bf16)))
    assert jnp.allclose(out, ref_f32, atol=5e-3, rtol=5e-2), \
        float(jnp.max(jnp.abs(out - ref_f32)))
    print("KERNEL_OK")
</pallas_src>

<mosaic_0001>
module attributes {stable_mosaic.version = 11 : i64} {
  func.func @_ffn_fused_kernel(%arg0: i32, %arg1: i32, %arg2: memref<8x128xbf16, #tpu.memory_space<vmem>>, %arg3: memref<128x128xbf16, #tpu.memory_space<vmem>>, %arg4: memref<1x128xf32, #tpu.memory_space<vmem>>, %arg5: memref<128x128xbf16, #tpu.memory_space<vmem>>, %arg6: memref<1x128xf32, #tpu.memory_space<vmem>>, %arg7: memref<8x128xf32, #tpu.memory_space<vmem>>, %arg8: memref<8x128xf32, #tpu.memory_space<vmem>>) attributes {dimension_semantics = [#tpu.dimension_semantics<parallel>, #tpu.dimension_semantics<arbitrary>], iteration_bounds = array<i64: 2, 1>, scalar_prefetch = 0 : i64, scratch_operands = 1 : i64, tpu.core_type = #tpu.core_type<tc>, window_params = [{transform_indices = @transform_0, window_bounds = array<i64: 8, 128>}, {pipeline_mode = #tpu.pipeline_mode<synchronous>, transform_indices = @transform_1, window_bounds = array<i64: 128, 128>}, {pipeline_mode = #tpu.pipeline_mode<synchronous>, transform_indices = @transform_2, window_bounds = array<i64: 1, 128>}, {pipeline_mode = #tpu.pipeline_mode<synchronous>, transform_indices = @transform_3, window_bounds = array<i64: 128, 128>}, {pipeline_mode = #tpu.pipeline_mode<synchronous>, transform_indices = @transform_4, window_bounds = array<i64: 1, 128>}, {transform_indices = @transform_5, window_bounds = array<i64: 8, 128>}]} {
    %c0_i32 = arith.constant 0 : i32
    %0 = arith.cmpi eq, %arg1, %c0_i32 : i32
    %1 = arith.extui %0 : i1 to i32
    %c0_i32_0 = arith.constant 0 : i32
    %2 = arith.cmpi ne, %1, %c0_i32_0 : i32
    scf.if %2 {
      %cst_16 = arith.constant 0.000000e+00 : f32
      %20 = vector.broadcast %cst_16 : f32 to vector<8x128xf32>
      %c0_17 = arith.constant 0 : index
      %c0_18 = arith.constant 0 : index
      %21 = vector.load %arg8[%c0_17, %c0_18] : memref<8x128xf32, #tpu.memory_space<vmem>>, vector<8x128xf32>
      tpu.vector_store %arg8[%c0_17, %c0_18], %20 {strides = array<i32>} : memref<8x128xf32, #tpu.memory_space<vmem>>, vector<8x128xf32>,
    } else {
    }
    %c0 = arith.constant 0 : index
    %c0_1 = arith.constant 0 : index
    %3 = vector.load %arg2[%c0, %c0_1] : memref<8x128xbf16, #tpu.memory_space<vmem>>, vector<8x128xbf16>
    %c0_2 = arith.constant 0 : index
    %c0_3 = arith.constant 0 : index
    %4 = vector.load %arg3[%c0_2, %c0_3] : memref<128x128xbf16, #tpu.memory_space<vmem>>, vector<128x128xbf16>
    %cst = arith.constant dense<0.000000e+00> : vector<8x128xf32>
    %5 = tpu.matmul %3, %4, %cst {dimension_numbers = #tpu.dot_dimension_numbers<[1], [0], [0], [1], [0, 0, 1, 1], [], []>} : vector<8x128xbf16>, vector<128x128xbf16>, vector<8x128xf32> -> vector<8x128xf32>
    %c0_4 = arith.constant 0 : index
    %c0_5 = arith.constant 0 : index
    %6 = vector.load %arg4[%c0_4, %c0_5] : memref<1x128xf32, #tpu.memory_space<vmem>>, vector<1x128xf32>
    %7 = vector.broadcast %6 : vector<1x128xf32> to vector<8x128xf32>
    %8 = arith.addf %5, %7 : vector<8x128xf32>
    %cst_6 = arith.constant 0.000000e+00 : f32
    %9 = vector.broadcast %cst_6 : f32 to vector<8x128xf32>
    %10 = arith.maximumf %8, %9 : vector<8x128xf32>
    %c0_7 = arith.constant 0 : index
    %c0_8 = arith.constant 0 : index
    %11 = vector.load %arg8[%c0_7, %c0_8] : memref<8x128xf32, #tpu.memory_space<vmem>>, vector<8x128xf32>
    %12 = arith.truncf %10 : vector<8x128xf32> to vector<8x128xbf16>
    %c0_9 = arith.constant 0 : index
    %c0_10 = arith.constant 0 : index
    %13 = vector.load %arg5[%c0_9, %c0_10] : memref<128x128xbf16, #tpu.memory_space<vmem>>, vector<128x128xbf16>
    %cst_11 = arith.constant dense<0.000000e+00> : vector<8x128xf32>
    %14 = tpu.matmul %12, %13, %cst_11 {dimension_numbers = #tpu.dot_dimension_numbers<[1], [0], [0], [1], [0, 0, 1, 1], [], []>} : vector<8x128xbf16>, vector<128x128xbf16>, vector<8x128xf32> -> vector<8x128xf32>
    %15 = arith.addf %11, %14 : vector<8x128xf32>
    %c0_12 = arith.constant 0 : index
    %c0_13 = arith.constant 0 : index
    %16 = vector.load %arg8[%c0_12, %c0_13] : memref<8x128xf32, #tpu.memory_space<vmem>>, vector<8x128xf32>
    tpu.vector_store %arg8[%c0_12, %c0_13], %15 {strides = array<i32>} : memref<8x128xf32, #tpu.memory_space<vmem>>, vector<8x128xf32>,
    %c0_i32_14 = arith.constant 0 : i32
    %17 = arith.cmpi eq, %arg1, %c0_i32_14 : i32
    %18 = arith.extui %17 : i1 to i32
    %c0_i32_15 = arith.constant 0 : i32
    %19 = arith.cmpi ne, %18, %c0_i32_15 : i32
    scf.if %19 {
      %c0_16 = arith.constant 0 : index
      %c0_17 = arith.constant 0 : index
      %20 = vector.load %arg8[%c0_16, %c0_17] : memref<8x128xf32, #tpu.memory_space<vmem>>, vector<8x128xf32>
      %c0_18 = arith.constant 0 : index
      %c0_19 = arith.constant 0 : index
      %21 = vector.load %arg6[%c0_18, %c0_19] : memref<1x128xf32, #tpu.memory_space<vmem>>, vector<1x128xf32>
      %22 = vector.broadcast %21 : vector<1x128xf32> to vector<8x128xf32>
      %23 = arith.addf %20, %22 : vector<8x128xf32>
      %c0_20 = arith.constant 0 : index
      %c0_21 = arith.constant 0 : index
      %24 = vector.load %arg7[%c0_20, %c0_21] : memref<8x128xf32, #tpu.memory_space<vmem>>, vector<8x128xf32>
      tpu.vector_store %arg7[%c0_20, %c0_21], %23 {strides = array<i32>} : memref<8x128xf32, #tpu.memory_space<vmem>>, vector<8x128xf32>,
    } else {
    }
    return
  }
  func.func @transform_0(%arg0: i32, %arg1: i32) -> (i32, i32) {
    %c0_i32 = arith.constant 0 : i32
    %c0_i32_0 = arith.constant 0 : i32
    return %arg0, %c0_i32 : i32, i32
  }
  func.func @transform_1(%arg0: i32, %arg1: i32) -> (i32, i32) {
    %c0_i32 = arith.constant 0 : i32
    %c0_i32_0 = arith.constant 0 : i32
    return %c0_i32, %arg1 : i32, i32
  }
  func.func @transform_2(%arg0: i32, %arg1: i32) -> (i32, i32) {
    %c0_i32 = arith.constant 0 : i32
    %c0_i32_0 = arith.constant 0 : i32
    return %c0_i32, %arg1 : i32, i32
  }
  func.func @transform_3(%arg0: i32, %arg1: i32) -> (i32, i32) {
    %c0_i32 = arith.constant 0 : i32
    %c0_i32_0 = arith.constant 0 : i32
    return %arg1, %c0_i32 : i32, i32
  }
  func.func @transform_4(%arg0: i32, %arg1: i32) -> (i32, i32) {
    %c0_i32 = arith.constant 0 : i32
    %c0_i32_0 = arith.constant 0 : i32
    %c0_i32_1 = arith.constant 0 : i32
    return %c0_i32, %c0_i32_0 : i32, i32
  }
  func.func @transform_5(%arg0: i32, %arg1: i32) -> (i32, i32) {
    %c0_i32 = arith.constant 0 : i32
    %c0_i32_0 = arith.constant 0 : i32
    return %arg0, %c0_i32 : i32, i32
  }
}

</mosaic_0001>

<bundles_post_ra>
// kernel: position_wise_ffn.1
= control target key start
LH: loop header
LB: loop body
LE: loop exit
PB: predicated region body
PF: predicated region fallthrough
CT: control target
= control target key end

     0   :  { %s740_s18 = smov 0   ;;  %s742_s19 = smov 0   ;;  %s831_s0 = inlined_call_operand.vmem [shape: bf16[16,128], index: 0, kind: input, shape index: {}]   ;;  %s832_s1 = inlined_call_operand.vmem [shape: bf16[128,128], index: 1, kind: input, shape index: {}]   ;;  %s833_s2 = inlined_call_operand.vmem [shape: f32[1,128], index: 2, kind: input, shape index: {}]   ;;  %s834_s3 = inlined_call_operand.vmem [shape: bf16[128,128], index: 3, kind: input, shape index: {}]   ;;  %s835_s4 = inlined_call_operand.vmem [shape: f32[1,128], index: 4, kind: input, shape index: {}]   ;;  %s836_s5 = inlined_call_operand.vmem [shape: f32[16,128], index: 5, kind: output, shape index: {}]  }
   0x1   :  { %s744_s20 = smov 0  }
   0x2 LB: > { %s27_s21 = sadd.s32 1, %s704_s19  ;;  %p575_p0 = scmp.ge.s32.totalorder %s708_s20, 1  ;;  %s708_s20 = sphi %s744_s20, %s15_s20   ;;  %s704_s19 = sphi %s742_s19, %s838_s19   ;;  %s700_s18 = sphi %s740_s18, %s837_s18  }
   0x3   : > { %p29_p1 = scmp.ge.s32.totalorder %s27_s21, 2  ;;  %p226_p2 = scmp.lt.s32.totalorder %s708_s20, 3 }
   0x5   : > { %s840_s21 = smov (%p29_p1, %s27_s21), 0  ;;  %p227_p3 = pnand %p575_p0, %p226_p2 }
   0x6   : > { %p264_p4 = scmp.lt.s32.totalorder (!%p227_p3), %s700_s18, 1 }
   0x7   : > { %230 = sbr.rel (%p227_p3) target bundleno = 310 (0x136), region = 40 }
   0xc   : > { %v651_v0 = vld [vmem:[%s832_s1 + $0x38] sm:$0xff]  ;;  %v650_v1 = vld [vmem:[%s832_s1 + $0x30] sm:$0xff]  ;;  %v649_v4 = vld [vmem:[%s832_s1 + $0x28] sm:$0xff]  ;;  %s842_s18 = smov (!%p264_p4, %s700_s18), 1 }
   0xd   : > { %359 = vmatpush.bf16.msra.mxu0 %v651_v0  ;;  %v659_v2 = vld [vmem:[%s834_s3 + $0x38] sm:$0xff]  ;;  %v658_v3 = vld [vmem:[%s834_s3 + $0x30] sm:$0xff]  ;;  %v657_v5 = vld [vmem:[%s834_s3 + $0x28] sm:$0xff]  ;;  %s576_s27 = sshll.u32 %s842_s18, 2  ;;  %s577_s14 = sshll.u32 %s842_s18, 3 }
   0xe   : > { %439 = vmatpush.bf16.msra.mxu1 %v659_v2  ;;  %v648_v6 = vld [vmem:[%s832_s1 + $0x20] sm:$0xff]  ;;  %v647_v8 = vld [vmem:[%s832_s1 + $0x18] sm:$0xff]  ;;  %v646_v10 = vld [vmem:[%s832_s1 + $0x10] sm:$0xff]  ;;  %s267_s7 = scalar_lea.vmem %s831_s0, %s576_s27  ;;  %s284_s23 = scalar_lea.vmem %s836_s5, %s577_s14 }
   0xf   : > { %v656_v7 = vld [vmem:[%s834_s3 + $0x20] sm:$0xff]  ;;  %v655_v9 = vld [vmem:[%s834_s3 + $0x18] sm:$0xff]  ;;  %v654_v11 = vld [vmem:[%s834_s3 + $0x10] sm:$0xff] }
  0x10   : > { %v645_v12 = vld [vmem:[%s832_s1 + $0x8] sm:$0xff]  ;;  %v644_v13 = vld [vmem:[%s832_s1] sm:$0xff] }
  0x11   : > { %360 = vmatpush.bf16.msra.mxu0 %v650_v1  ;;  %v290_v14 = vld [vmem:[%s267_s7] sm:$0xf]  ;;  %v653_v15 = vld [vmem:[%s834_s3 + $0x8] sm:$0xff] }
  0x12   : > { %440 = vmatpush.bf16.msra.mxu1 %v658_v3  ;;  %v652_v16 = vld [vmem:[%s834_s3] sm:$0xff] }
  0x13   : > { %v684_v17 = vld [vmem:[%s833_s2] ss:$0 sm:$0xff] }
  0x14   : > { %v685_v23 = vld [vmem:[%s835_s4] ss:$0 sm:$0xff] }
  0x15   : > { %361 = vmatpush.bf16.msra.mxu0 %v649_v4 }
  0x16   : > { %441 = vmatpush.bf16.msra.mxu1 %v657_v5 }
  0x19   : > { %362 = vmatpush.bf16.msra.mxu0 %v648_v6 }
  0x1a   : > { %442 = vmatpush.bf16.msra.mxu1 %v656_v7 }
  0x1d   : > { %363 = vmatpush.bf16.msra.mxu0 %v647_v8 }
  0x1e   : > { %443 = vmatpush.bf16.msra.mxu1 %v655_v9 }
  0x21   : > { %364 = vmatpush.bf16.msra.mxu0 %v646_v10 }
  0x22   : > { %444 = vmatpush.bf16.msra.mxu1 %v654_v11 }
  0x25   : > { %365 = vmatpush.bf16.msra.mxu0 %v645_v12 }
  0x26   : > { %445 = vmatpush.bf16.msra.mxu1 %v653_v15 }
  0x29   : > { %366 = vmatpush.bf16.msra.mxu0 %v644_v13 }
  0x2a   : > { %446 = vmatpush.bf16.msra.mxu1 %v652_v16 }
  0x2c   : > { %367 = vmatmul.bf16.vlgmr.msra.gmra.mxu0 %v290_v14 }
  0xa9   : > { %v368_v18 = vpop.f32.mrf.mxu0 }
  0xaa   : > { %v369_v19 = vadd.f32 %v684_v17, %v368_v18 }
  0xac   : > { %v372_v20 = vmax.f32 %v369_v19, 0.0 }
  0xae   : > { %v374_v21 = vpack.c.bf16 %v372_v20, %v372_v20 }
  0xb0   : > { %447 = vmatmul.bf16.vlgmr.msra.gmra.mxu1 %v374_v21 }
  0xb1   : > { %v370_v22 = vpop.f32.mrf.mxu0 }
 0x12d   : > { %v448_v24 = vpop.f32.mrf.mxu1 }
 0x12e   : > { %v462_v25 = vadd.f32 %v685_v23, %v448_v24 }
 0x130   : > { %463 = vst [vmem:[%s284_s23] sm:$0xff] %v462_v25 }
 0x135   : > { %v450_v26 = vpop.f32.mrf.mxu1 }
 0x136 PF: > { %s15_s20 = sadd.s32 1, %s708_s20   ;;  %s837_s18 = smov %s704_s19 }
 0x137   : > { %p12_p5 = scmp.ge.s32.totalorder %s15_s20, 4   ;;  %s838_s19 = smov %s840_s21 }
 0x139   :  { %14 = sbr.rel (!%p12_p5) target bundleno = 2 (0x2), region = 87 }

</bundles_post_ra>
